<compile_context>
chip_gen: v7x
topology: tpu7x:2x2x1
jax: 0.10.0
libtpu: 0.0.40
codegen_flags: <defaults>
</compile_context>

<pallas_src>
import jax
import jax.numpy as jnp
from jax.experimental import pallas as pl
from jax.experimental.pallas import tpu as pltpu

EPS = 1e-5
LANE = 128      # Cout padded to a multiple of this -> dense, unmasked vector stores
SUBLANE = 8
# bf16 MXU operands (f32 accumulate + f32 epilogue): ~2x MXU rate and ~2x less HBM/VMEM
# traffic on v5e/v6e/v7x.  Set to jnp.float32 for tight numerics (and tighten the test tol).
MXU_DTYPE = jnp.bfloat16

# 3x3 tap order with the CENTER tap first, so the 1x1 shortcut conv reads the patch prefix
# columns [0:Cin] (a 3x3 pad=1 stride=s center tap samples exactly x[s*oh, s*ow], i.e. the
# 1x1 pad=0 stride=s input sample).
TAPS = [(1, 1)] + [(i, j) for i in range(3) for j in range(3) if (i, j) != (1, 1)]


def _round_up(x, m):
    return (x + m - 1) // m * m


def _largest_divisor(n, target, align=1):
    """Largest divisor of n that is a multiple of `align` and <= max(target, align)."""
    best = align
    d = align
    limit = min(n, max(target, align))
    while d <= limit:
        if n % d == 0:
            best = d
        d += align
    return best


# ---------------------------------------------------------------------------
# Stage 1: fused  h1 = relu(p @ W1f + b1)   and   sc = p[:, :Cin_p] @ Wscf + bsc
# ---------------------------------------------------------------------------
def stage1_kernel(p_ref, w1_ref, b1_ref, wsc_ref, bsc_ref, h1_ref, sc_ref):
    p = p_ref[...]
    # conv1 (3x3 / stride s) + folded BN + ReLU
    acc1 = jnp.dot(p, w1_ref[...], preferred_element_type=jnp.float32)
    h1_ref[...] = jnp.maximum(acc1 + b1_ref[...], 0.0).astype(h1_ref.dtype)
    # shortcut conv1x1/stride s + folded BN: dense matmul on the center-tap prefix only.
    cinp = wsc_ref.shape[0]
    accs = jnp.dot(p[:, :cinp], wsc_ref[...], preferred_element_type=jnp.float32)
    sc_ref[...] = (accs + bsc_ref[...]).astype(sc_ref.dtype)


def stage1(patches, w1f, b1, wscf, bsc, *, tm):
    Mp, Kp = patches.shape
    Cp = w1f.shape[1]
    cinp = wscf.shape[0]
    return pl.pallas_call(
        stage1_kernel,
        out_shape=(jax.ShapeDtypeStruct((Mp, Cp), MXU_DTYPE),
                   jax.ShapeDtypeStruct((Mp, Cp), MXU_DTYPE)),
        grid=(Mp // tm,),
        in_specs=[
            pl.BlockSpec((tm, Kp), lambda i: (i, 0)),     # patch tile (pipelined over M)
            pl.BlockSpec((Kp, Cp), lambda i: (0, 0)),     # folded conv1 weight (resident)
            pl.BlockSpec((1, Cp), lambda i: (0, 0)),      # conv1 bias (f32)
            pl.BlockSpec((cinp, Cp), lambda i: (0, 0)),   # dense folded shortcut weight
            pl.BlockSpec((1, Cp), lambda i: (0, 0)),      # shortcut bias (f32)
        ],
        out_specs=(pl.BlockSpec((tm, Cp), lambda i: (i, 0)),
                   pl.BlockSpec((tm, Cp), lambda i: (i, 0))),
        compiler_params=pltpu.CompilerParams(dimension_semantics=("parallel",)),
    )(patches, w1f, b1, wscf, bsc)


# ---------------------------------------------------------------------------
# Stage 2: out = relu( conv3x3_s1(h1) * scale2 + bias2 + sc ), row-tiled over (N, Ho//TH)
# ---------------------------------------------------------------------------
def stage2_kernel(h1m_ref, h1a_ref, h1b_ref, sc_ref, w2_ref, b2_ref, o_ref, win_ref):
    th = h1m_ref.shape[1]
    _, _, Wo, Cp = sc_ref.shape
    # Assemble the (th+2)-row halo window in VMEM scratch (major-axis stores: cheap).
    win_ref[0:th] = h1m_ref[0]
    win_ref[th:th + 1] = h1a_ref[0]
    win_ref[th + 1:th + 2] = h1b_ref[0]
    # Hoist the width-shifted (dj) loads out of the 3x3 loop: 3 sublane-offset window
    # loads instead of 9; the di slices below are cheap major-axis slices.
    cols = [win_ref[:, dj:dj + Wo, :] for dj in range(3)]           # each (th+2, Wo, Cp)
    acc = sc_ref[0].astype(jnp.float32).reshape(th * Wo, Cp) + b2_ref[...]
    for di in range(3):
        for dj in range(3):
            win = cols[dj][di:di + th]                              # (th, Wo, Cp)
            acc = acc + jnp.dot(win.reshape(th * Wo, Cp), w2_ref[di * 3 + dj],
                                preferred_element_type=jnp.float32)
    o_ref[...] = jnp.maximum(acc, 0.0).reshape(1, th, Wo, Cp).astype(o_ref.dtype)


def stage2(h1_pad, sc4, w2f, b2, *, th):
    N, Hp2, Wp2, Cp = h1_pad.shape
    _, Ho, Wo, _ = sc4.shape
    return pl.pallas_call(
        stage2_kernel,
        out_shape=jax.ShapeDtypeStruct((N, Ho, Wo, Cp), jnp.float32),
        grid=(N, Ho // th),
        in_specs=[
            # main th-row slab of padded h1: padded rows [r*th, r*th+th)
            pl.BlockSpec((1, th, Wp2, Cp), lambda n, r: (n, r, 0, 0)),
            # 2-row bottom halo as two 1-row blocks (block size 1 -> index == row index)
            pl.BlockSpec((1, 1, Wp2, Cp), lambda n, r: (n, r * th + th, 0, 0)),
            pl.BlockSpec((1, 1, Wp2, Cp), lambda n, r: (n, r * th + th + 1, 0, 0)),
            pl.BlockSpec((1, th, Wo, Cp), lambda n, r: (n, r, 0, 0)),   # shortcut tile
            pl.BlockSpec((9, Cp, Cp), lambda n, r: (0, 0, 0)),          # folded conv2 w
            pl.BlockSpec((1, Cp), lambda n, r: (0, 0)),                 # conv2 bias
        ],
        out_specs=pl.BlockSpec((1, th, Wo, Cp), lambda n, r: (n, r, 0, 0)),
        scratch_shapes=[pltpu.VMEM((th + 2, Wp2, Cp), h1_pad.dtype)],
        compiler_params=pltpu.CompilerParams(
            dimension_semantics=("parallel", "parallel")),
    )(h1_pad, h1_pad, h1_pad, sc4, w2f, b2)


# ---------------------------------------------------------------------------
# Glue: im2col (center tap first), BN folding, weight packing (plain JAX)
# ---------------------------------------------------------------------------
def im2col_nhwc(x, stride):
    """x: (N,H,W,C) -> ((N*Ho*Wo, 9*C) patches in TAPS order, (N, Ho, Wo))."""
    N, H, W, C = x.shape
    xp = jnp.pad(x, ((0, 0), (1, 1), (1, 1), (0, 0)))
    Ho = (H + 2 - 3) // stride + 1
    Wo = (W + 2 - 3) // stride + 1
    cols = [xp[:, i:i + stride * Ho:stride, j:j + stride * Wo:stride, :] for (i, j) in TAPS]
    patches = jnp.concatenate(cols, axis=-1)
    return patches.reshape(N * Ho * Wo, 9 * C), (N, Ho, Wo)


def fold_bn(gamma, beta, mean, var):
    scale = gamma / jnp.sqrt(var + EPS)
    return scale, beta - mean * scale


def resblock_forward(x_nchw, params, stride, *, tm_target=512):
    """ResBlock.forward with eval-mode BN.  (N,Cin,H,W) f32 -> (N,Cout,Ho,Wo) f32."""
    x = jnp.transpose(x_nchw, (0, 2, 3, 1)).astype(MXU_DTYPE)       # NHWC, MXU dtype
    Cout, Cin = params["w1"].shape[:2]
    Cp = _round_up(Cout, LANE)
    Cin_p = _round_up(Cin, SUBLANE)
    pad_c = Cp - Cout

    s1, b1 = fold_bn(*params["bn1"])
    s2, b2 = fold_bn(*params["bn2"])
    ss, bs = fold_bn(*params["bn_sc"])

    # conv1 weight OIHW -> (9*Cin, Cout) rows in TAPS order, BN scale folded into columns.
    wt = jnp.transpose(params["w1"], (2, 3, 1, 0))                  # (3,3,Cin,Cout)
    w1 = jnp.stack([wt[i, j] for (i, j) in TAPS], 0).reshape(9 * Cin, Cout) * s1[None, :]
    # dense folded shortcut 1x1 weight: matches patch columns [0:Cin] (center tap).
    wsc = params["w_sc"][:, :, 0, 0].T * ss[None, :]                # (Cin, Cout)

    K = 9 * Cin
    Kp = _round_up(K, SUBLANE)
    w1p = jnp.pad(w1, ((0, Kp - K), (0, pad_c))).astype(MXU_DTYPE)
    wscp = jnp.pad(wsc, ((0, Cin_p - Cin), (0, pad_c))).astype(MXU_DTYPE)
    b1p = jnp.pad(b1, (0, pad_c)).reshape(1, Cp)
    bsp = jnp.pad(bs, (0, pad_c)).reshape(1, Cp)
    b2p = jnp.pad(b2, (0, pad_c)).reshape(1, Cp)

    # conv2 weight OIHW -> (9, Cp, Cp), BN folded, channel padded.
    w2 = jnp.transpose(params["w2"], (2, 3, 1, 0)) * s2[None, None, None, :]
    w2p = jnp.pad(w2, ((0, 0), (0, 0), (0, pad_c), (0, pad_c))).reshape(9, Cp, Cp)
    w2p = w2p.astype(MXU_DTYPE)

    # ---- stage 1: fused conv1(3x3/s)+BN+ReLU and shortcut conv1x1(s)+BN ----------------
    patches, (N, Ho, Wo) = im2col_nhwc(x, stride)
    M = N * Ho * Wo
    Mp = _round_up(M, SUBLANE)
    tm = _largest_divisor(Mp, tm_target, align=SUBLANE)             # <= 7 padded rows
    p1p = jnp.pad(patches, ((0, Mp - M), (0, Kp - K)))

    h1, sc = stage1(p1p, w1p, b1p, wscp, bsp, tm=tm)                # (Mp, Cp) in MXU_DTYPE

    # ---- stage 2: conv2 3x3/s1 + BN + shortcut + ReLU, row-tiled -----------------------
    h1_pad = jnp.pad(h1[:M].reshape(N, Ho, Wo, Cp), ((0, 0), (1, 1), (1, 1), (0, 0)))
    sc4 = sc[:M].reshape(N, Ho, Wo, Cp)
    th = _largest_divisor(Ho, max(1, 512 // max(Wo, 1)))            # ~512 patch rows/tile
    out = stage2(h1_pad, sc4, w2p, b2p, th=th)                      # (N, Ho, Wo, Cp) f32

    # NOTE: keep NHWC (and fuse the Cout slice into the stage-2 store) if the surrounding
    # model tolerates it; NCHW is returned to match the PyTorch module.
    return jnp.transpose(out[..., :Cout], (0, 3, 1, 2))


# ---------------------------------------------------------------------------
# Pure-JAX reference (lax.conv) for correctness check
# ---------------------------------------------------------------------------
def reference_forward(x, params, stride):
    def conv(x, w, s, p):
        return jax.lax.conv_general_dilated(
            x, w, window_strides=(s, s), padding=[(p, p), (p, p)],
            dimension_numbers=("NCHW", "OIHW", "NCHW"))

    def bn(x, stats):
        g, b, m, v = stats
        sc = g / jnp.sqrt(v + EPS)
        return x * sc[None, :, None, None] + (b - m * sc)[None, :, None, None]

    sc = bn(conv(x, params["w_sc"], stride, 0), params["bn_sc"])
    h = jax.nn.relu(bn(conv(x, params["w1"], stride, 1), params["bn1"]))
    h = bn(conv(h, params["w2"], 1, 1), params["bn2"])
    return jax.nn.relu(h + sc)


# ---------------------------------------------------------------------------
def make_params(key, cin, cout):
    ks = jax.random.split(key, 6)

    def bn_stats(k):
        k1, k2, k3, k4 = jax.random.split(k, 4)
        gamma = 1.0 + 0.1 * jax.random.normal(k1, (cout,), jnp.float32)
        beta = 0.1 * jax.random.normal(k2, (cout,), jnp.float32)
        mean = 0.1 * jax.random.normal(k3, (cout,), jnp.float32)
        var = jnp.abs(0.5 + 0.1 * jax.random.normal(k4, (cout,), jnp.float32))
        return (gamma, beta, mean, var)

    return {
        "w1": 0.1 * jax.random.normal(ks[0], (cout, cin, 3, 3), jnp.float32),
        "bn1": bn_stats(ks[1]),
        "w2": 0.1 * jax.random.normal(ks[2], (cout, cout, 3, 3), jnp.float32),
        "bn2": bn_stats(ks[3]),
        "w_sc": 0.1 * jax.random.normal(ks[4], (cout, cin, 1, 1), jnp.float32),
        "bn_sc": bn_stats(ks[5]),
    }


if __name__ == "__main__":
    key = jax.random.PRNGKey(0)
    kx, kp = jax.random.split(key)

    N, Cin, H, W = 2, 4, 16, 16
    Cout, stride = 8, 2

    x = jax.random.normal(kx, (N, Cin, H, W), jnp.float32)
    params = make_params(kp, Cin, Cout)

    out = jax.block_until_ready(resblock_forward(x, params, stride))
    ref = jax.block_until_ready(reference_forward(x, params, stride))

    assert out.shape == (N, Cout, H // stride, W // stride), out.shape
    tol = 1e-4 if MXU_DTYPE == jnp.float32 else 5e-2   # bf16 MXU operands -> looser tol
    err = float(jnp.max(jnp.abs(out - ref)))
    assert jnp.allclose(out, ref, atol=tol, rtol=tol), err

    print("KERNEL_OK")
</pallas_src>

<mosaic_0001>
module attributes {stable_mosaic.version = 11 : i64} {
  func.func @stage1_kernel(%arg0: i32, %arg1: memref<128x40xbf16, #tpu.memory_space<vmem>>, %arg2: memref<40x128xbf16, #tpu.memory_space<vmem>>, %arg3: memref<1x128xf32, #tpu.memory_space<vmem>>, %arg4: memref<8x128xbf16, #tpu.memory_space<vmem>>, %arg5: memref<1x128xf32, #tpu.memory_space<vmem>>, %arg6: memref<128x128xbf16, #tpu.memory_space<vmem>>, %arg7: memref<128x128xbf16, #tpu.memory_space<vmem>>) attributes {dimension_semantics = [#tpu.dimension_semantics<parallel>], iteration_bounds = array<i64: 1>, scalar_prefetch = 0 : i64, scratch_operands = 0 : i64, tpu.core_type = #tpu.core_type<tc>, window_params = [{transform_indices = @transform_0, window_bounds = array<i64: 128, 40>}, {pipeline_mode = #tpu.pipeline_mode<synchronous>, transform_indices = @transform_1, window_bounds = array<i64: 40, 128>}, {pipeline_mode = #tpu.pipeline_mode<synchronous>, transform_indices = @transform_2, window_bounds = array<i64: 1, 128>}, {pipeline_mode = #tpu.pipeline_mode<synchronous>, transform_indices = @transform_3, window_bounds = array<i64: 8, 128>}, {pipeline_mode = #tpu.pipeline_mode<synchronous>, transform_indices = @transform_4, window_bounds = array<i64: 1, 128>}, {transform_indices = @transform_5, window_bounds = array<i64: 128, 128>}, {transform_indices = @transform_6, window_bounds = array<i64: 128, 128>}]} {
    %c0 = arith.constant 0 : index
    %c0_0 = arith.constant 0 : index
    %0 = vector.load %arg1[%c0, %c0_0] : memref<128x40xbf16, #tpu.memory_space<vmem>>, vector<128x40xbf16>
    %c0_1 = arith.constant 0 : index
    %c0_2 = arith.constant 0 : index
    %1 = vector.load %arg2[%c0_1, %c0_2] : memref<40x128xbf16, #tpu.memory_space<vmem>>, vector<40x128xbf16>
    %cst = arith.constant dense<0.000000e+00> : vector<128x128xf32>
    %2 = tpu.matmul %0, %1, %cst {dimension_numbers = #tpu.dot_dimension_numbers<[1], [0], [0], [1], [0, 0, 1, 1], [], []>} : vector<128x40xbf16>, vector<40x128xbf16>, vector<128x128xf32> -> vector<128x128xf32>
    %c0_3 = arith.constant 0 : index
    %c0_4 = arith.constant 0 : index
    %3 = vector.load %arg3[%c0_3, %c0_4] : memref<1x128xf32, #tpu.memory_space<vmem>>, vector<1x128xf32>
    %4 = vector.broadcast %3 : vector<1x128xf32> to vector<128x128xf32>
    %5 = arith.addf %2, %4 : vector<128x128xf32>
    %cst_5 = arith.constant 0.000000e+00 : f32
    %6 = vector.broadcast %cst_5 : f32 to vector<128x128xf32>
    %7 = arith.maximumf %5, %6 : vector<128x128xf32>
    %8 = arith.truncf %7 : vector<128x128xf32> to vector<128x128xbf16>
    %c0_6 = arith.constant 0 : index
    %c0_7 = arith.constant 0 : index
    %9 = vector.load %arg6[%c0_6, %c0_7] : memref<128x128xbf16, #tpu.memory_space<vmem>>, vector<128x128xbf16>
    tpu.vector_store %arg6[%c0_6, %c0_7], %8 {strides = array<i32>} : memref<128x128xbf16, #tpu.memory_space<vmem>>, vector<128x128xbf16>,
    %10 = vector.extract_strided_slice %0 {offsets = [0, 0], sizes = [128, 8], strides = [1, 1]} : vector<128x40xbf16> to vector<128x8xbf16>
    %c0_8 = arith.constant 0 : index
    %c0_9 = arith.constant 0 : index
    %11 = vector.load %arg4[%c0_8, %c0_9] : memref<8x128xbf16, #tpu.memory_space<vmem>>, vector<8x128xbf16>
    %cst_10 = arith.constant dense<0.000000e+00> : vector<128x128xf32>
    %12 = tpu.matmul %10, %11, %cst_10 {dimension_numbers = #tpu.dot_dimension_numbers<[1], [0], [0], [1], [0, 0, 1, 1], [], []>} : vector<128x8xbf16>, vector<8x128xbf16>, vector<128x128xf32> -> vector<128x128xf32>
    %c0_11 = arith.constant 0 : index
    %c0_12 = arith.constant 0 : index
    %13 = vector.load %arg5[%c0_11, %c0_12] : memref<1x128xf32, #tpu.memory_space<vmem>>, vector<1x128xf32>
    %14 = vector.broadcast %13 : vector<1x128xf32> to vector<128x128xf32>
    %15 = arith.addf %12, %14 : vector<128x128xf32>
    %16 = arith.truncf %15 : vector<128x128xf32> to vector<128x128xbf16>
    %c0_13 = arith.constant 0 : index
    %c0_14 = arith.constant 0 : index
    %17 = vector.load %arg7[%c0_13, %c0_14] : memref<128x128xbf16, #tpu.memory_space<vmem>>, vector<128x128xbf16>
    tpu.vector_store %arg7[%c0_13, %c0_14], %16 {strides = array<i32>} : memref<128x128xbf16, #tpu.memory_space<vmem>>, vector<128x128xbf16>,
    return
  }
  func.func @transform_0(%arg0: i32) -> (i32, i32) {
    %c0_i32 = arith.constant 0 : i32
    %c0_i32_0 = arith.constant 0 : i32
    return %arg0, %c0_i32 : i32, i32
  }
  func.func @transform_1(%arg0: i32) -> (i32, i32) {
    %c0_i32 = arith.constant 0 : i32
    %c0_i32_0 = arith.constant 0 : i32
    %c0_i32_1 = arith.constant 0 : i32
    return %c0_i32, %c0_i32_0 : i32, i32
  }
  func.func @transform_2(%arg0: i32) -> (i32, i32) {
    %c0_i32 = arith.constant 0 : i32
    %c0_i32_0 = arith.constant 0 : i32
    %c0_i32_1 = arith.constant 0 : i32
    return %c0_i32, %c0_i32_0 : i32, i32
  }
  func.func @transform_3(%arg0: i32) -> (i32, i32) {
    %c0_i32 = arith.constant 0 : i32
    %c0_i32_0 = arith.constant 0 : i32
    %c0_i32_1 = arith.constant 0 : i32
    return %c0_i32, %c0_i32_0 : i32, i32
  }
  func.func @transform_4(%arg0: i32) -> (i32, i32) {
    %c0_i32 = arith.constant 0 : i32
    %c0_i32_0 = arith.constant 0 : i32
    %c0_i32_1 = arith.constant 0 : i32
    return %c0_i32, %c0_i32_0 : i32, i32
  }
  func.func @transform_5(%arg0: i32) -> (i32, i32) {
    %c0_i32 = arith.constant 0 : i32
    %c0_i32_0 = arith.constant 0 : i32
    return %arg0, %c0_i32 : i32, i32
  }
  func.func @transform_6(%arg0: i32) -> (i32, i32) {
    %c0_i32 = arith.constant 0 : i32
    %c0_i32_0 = arith.constant 0 : i32
    return %arg0, %c0_i32 : i32, i32
  }
}

</mosaic_0001>

<bundles_post_ra>
// kernel: tpu_custom_call.1
= control target key start
LH: loop header
LB: loop body
LE: loop exit
PB: predicated region body
PF: predicated region fallthrough
CT: control target
= control target key end

     0   :  { %12 = vsyncpa [#allocation3], 0  ;;  %vm133_vm0 = vcmask 1043456   ;;  %vm338_vm1 = vcmask 64512   ;;  %vm108_vm2 = vcmask 326656   ;;  %s1046_s0 = inlined_call_operand.vmem [shape: bf16[128,40], index: 0, kind: input, shape index: {}]   ;;  %s1047_s1 = inlined_call_operand.vmem [shape: bf16[40,128], index: 1, kind: input, shape index: {}]   ;;  %s1048_s2 = inlined_call_operand.vmem [shape: f32[1,128], index: 2, kind: input, shape index: {}]   ;;  %s1049_s3 = inlined_call_operand.vmem [shape: bf16[8,128], index: 3, kind: input, shape index: {}]   ;;  %s1050_s4 = inlined_call_operand.vmem [shape: f32[1,128], index: 4, kind: input, shape index: {}]   ;;  %s1051_s5 = inlined_call_operand.hbm [shape: bf16[128,128], index: 5, kind: output, shape index: {0}]   ;;  %s1052_s6 = inlined_call_operand.hbm [shape: bf16[128,128], index: 6, kind: output, shape index: {1}]  }
   0x1   :  { %v820_v0 = vld [vmem:[%s1047_s1] sm:$0xff]   ;;  %v821_v1 = vld [vmem:[%s1047_s1 + $0x8] sm:$0xff]   ;;  %v822_v3 = vld [vmem:[%s1047_s1 + $0x10] ss:$0 sps:$4 sm:$0xff]  }
   0x2   :  { %774 = vmatprep.subr.bf16.mxu0 %v820_v0  ;;  %v330_v2 = vld [vmem:[%s1049_s3] sm:$0xf]  ;;  %v824_v6 = vld [vmem:[%s1046_s0 + $0x8] sm:$0xff]   ;;  %v825_v7 = vld [vmem:[%s1046_s0 + $0x10] sm:$0xff]   ;;  %v135_v8 = vsel %vm133_vm0, %v822_v3, 0 }
   0x3   :  { %775 = vmatpush3.bf16.msra.mxu0 %v820_v0  ;;  %815 = vmatprep.subr.msk.bf16.mxu1 %vm133_vm0, %v330_v2  ;;  %v356_v4 = vsel %vm133_vm0, %v330_v2, 0  ;;  %v823_v5 = vld [vmem:[%s1046_s0] sm:$0xff]   ;;  %v826_v9 = vld [vmem:[%s1046_s0 + $0x18] sm:$0xff]  }
   0x4   :  { %776 = vmatprep.subr.bf16.mxu0 %v821_v1  ;;  %797 = vmatpush3.bf16.msra.mxu1 %v356_v4 }
   0x5   :  { %798 = vmatprep.mubr.msk.bf16.mxu1 %vm338_vm1, %v823_v5  ;;  %780 = vmatprep.mubr.msk.bf16.mxu0 %vm108_vm2, %v823_v5 }
   0x7   :  { %777 = vmatpush3.bf16.msra.mxu0 %v821_v1  ;;  %799 = vmatmul.mubr.msk.bf16.vlgmr.msra.gmra.mrb[0].mxu1 %vm338_vm1, %v824_v6 }
   0x8   :  { %814 = vmatprep.subr.msk.bf16.mxu0 %vm133_vm0, %v822_v3  ;;  %802 = vmatprep.mubr.msk.bf16.mxu1 %vm338_vm1, %v825_v7 }
   0xb   :  { %779 = vmatpush3.bf16.msra.mxu0 %v135_v8 }
   0xc   :  { %13 = vsyncpa [#allocation5], 0  ;;  %v827_v10 = vld [vmem:[%s1046_s0 + $0x20] sm:$0xff]   ;;  %v828_v11 = vld [vmem:[%s1046_s0 + $0x28] sm:$0xff]  }
   0xd   :  { %v829_v12 = vld [vmem:[%s1046_s0 + $0x30] sm:$0xff]   ;;  %v830_v13 = vld [vmem:[%s1046_s0 + $0x38] sm:$0xff]   ;;  %v977_v14 = vld [vmem:[%s1050_s4] ss:$0 sm:$0xff] }
   0xe   :  { %781 = vmatmul.mubr.msk.bf16.vlgmr.msra.gmra.mrb[0].mxu0 %vm108_vm2, %v824_v6  ;;  %v986_v23 = vld [vmem:[%s1048_s2] ss:$0 sm:$0xff]  ;;  %s879_s2 = smov [#allocation4]  }
   0xf   :  { %784 = vmatprep.mubr.msk.bf16.mxu0 %vm108_vm2, %v825_v7  ;;  %803 = vmatmul.mubr.msk.bf16.gmra.mrb[4].mxu1 %vm338_vm1, %v826_v9  ;;  %s552_s4 = sshll.u32 %s879_s2, 4  ;;  %s553_s4 = int_to_ptr.vmem [resolvable:$true] %s552_s4 }
  0x10   :  { %806 = vmatprep.mubr.msk.bf16.mxu1 %vm338_vm1, %v827_v10  ;;  %s831_s22 = scalar_lea.vmem %s553_s4, 1024  ;;  %p836_p1 = scmp.lt.s32.totalorder %s553_s4, %s553_s4 }
  0x11   :  { %p832_p0 = scmp.ne.s32.totalorder %s553_s4, %s831_s22  ;;  %p837_p2 = scmp.lt.s32.totalorder %s831_s22, %s831_s22 }
  0x13   :  { %p838_p3 = por %p837_p2, %p836_p1 }
  0x15   :  { %p839_p4 = pnand %p838_p3, %p832_p0 }
  0x16   :  { %785 = vmatmul.mubr.msk.bf16.gmra.mrb[4].mxu0 %vm108_vm2, %v826_v9 }
  0x17   :  { %788 = vmatprep.mubr.msk.bf16.mxu0 %vm108_vm2, %v827_v10  ;;  %807 = vmatmul.mubr.msk.bf16.gmra.mrb[8].mxu1 %vm338_vm1, %v828_v11 }
  0x18   :  { %810 = vmatprep.mubr.msk.bf16.mxu1 %vm338_vm1, %v829_v12 }
  0x1e   :  { %789 = vmatmul.mubr.msk.bf16.gmra.mrb[8].mxu0 %vm108_vm2, %v828_v11 }
  0x1f   :  { %792 = vmatprep.mubr.msk.bf16.mxu0 %vm108_vm2, %v829_v12  ;;  %811 = vmatmul.mubr.msk.bf16.gmra.mrb[12].mxu1 %vm338_vm1, %v830_v13 }
  0x26   :  { %793 = vmatmul.mubr.msk.bf16.gmra.mrb[12].mxu0 %vm108_vm2, %v830_v13 }
  0xda   :  { %v800_v15 = vpop.f32.mrb[0].mxu1 }
  0xdb   :  { %v401_v16 = vadd.f32 %v800_v15, %v977_v14  ;;  %v392_v17 = vpop.f32.mrb[1].mxu1 }
  0xdc   :  { %v393_v18 = vadd.f32 %v977_v14, %v392_v17  ;;  %v801_v19 = vpop.f32.mrb[2].mxu1 }
  0xdd   :  { %v404_v20 = vadd.f32 %v801_v19, %v977_v14  ;;  %v395_v21 = vpop.f32.mrb[3].mxu1 }
  0xde   :  { %v396_v22 = vadd.f32 %v977_v14, %v395_v21 }
  0xdf   :  { %v708_v24 = vpack.c.bf16 %v404_v20, %v401_v16 }
  0xe0   :  { %v703_v25 = vpack.c.bf16 %v396_v22, %v393_v18 }
  0xe1   :  { %v782_v26 = vpop.f32.mrb[0].mxu0  ;;  %747 = vst [vmem:[#allocation4 + $0x8] sm:$0xff] %v708_v24  }
  0xe2   :  { %v180_v27 = vadd.f32 %v782_v26, %v986_v23  ;;  %v171_v28 = vpop.f32.mrb[1].mxu0  ;;  %704 = vst [vmem:[#allocation4] sm:$0xff] %v703_v25   ;;  %v804_v29 = vpop.f32.mrb[4].mxu1 }
  0xe3   :  { %v172_v30 = vadd.f32 %v986_v23, %v171_v28  ;;  %v783_v31 = vpop.f32.mrb[2].mxu0  ;;  %v417_v32 = vadd.f32 %v804_v29, %v977_v14  ;;  %v408_v33 = vpop.f32.mrb[5].mxu1 }
  0xe4   :  { %v183_v34 = vadd.f32 %v783_v31, %v986_v23  ;;  %v174_v35 = vpop.f32.mrb[3].mxu0  ;;  %v409_v36 = vadd.f32 %v977_v14, %v408_v33  ;;  %v805_v37 = vpop.f32.mrb[6].mxu1  ;;  %v236_v41 = vmax.f32 %v180_v27, 0.0 }
  0xe5   :  { %v175_v38 = vadd.f32 %v986_v23, %v174_v35  ;;  %v420_v39 = vadd.f32 %v805_v37, %v977_v14  ;;  %v411_v40 = vpop.f32.mrb[7].mxu1  ;;  %v234_v44 = vmax.f32 %v172_v30, 0.0 }
  0xe6   :  { %v237_v42 = vmax.f32 %v183_v34, 0.0  ;;  %v412_v43 = vadd.f32 %v977_v14, %v411_v40 }
  0xe7   :  { %v235_v45 = vmax.f32 %v175_v38, 0.0  ;;  %v718_v46 = vpack.c.bf16 %v420_v39, %v417_v32 }
  0xe8   :  { %v668_v47 = vpack.c.bf16 %v237_v42, %v236_v41  ;;  %v713_v48 = vpack.c.bf16 %v412_v43, %v409_v36 }
  0xe9   :  { %v663_v49 = vpack.c.bf16 %v235_v45, %v234_v44  ;;  %v786_v50 = vpop.f32.mrb[4].mxu0  ;;  %749 = vst [vmem:[#allocation4 + $0x18] sm:$0xff] %v718_v46  }
  0xea   :  { %740 = vst [vmem:[#allocation2 + $0x8] sm:$0xff] %v668_v47   ;;  %v196_v51 = vadd.f32 %v786_v50, %v986_v23  ;;  %v187_v52 = vpop.f32.mrb[5].mxu0  ;;  %748 = vst [vmem:[#allocation4 + $0x10] sm:$0xff] %v713_v48   ;;  %v808_v53 = vpop.f32.mrb[8].mxu1 }
  0xeb   :  { %664 = vst [vmem:[#allocation2] sm:$0xff] %v663_v49   ;;  %v188_v54 = vadd.f32 %v986_v23, %v187_v52  ;;  %v787_v55 = vpop.f32.mrb[6].mxu0  ;;  %v433_v56 = vadd.f32 %v808_v53, %v977_v14  ;;  %v424_v57 = vpop.f32.mrb[9].mxu1 }
  0xec   :  { %v199_v58 = vadd.f32 %v787_v55, %v986_v23  ;;  %v190_v59 = vpop.f32.mrb[7].mxu0  ;;  %v425_v60 = vadd.f32 %v977_v14, %v424_v57  ;;  %v809_v61 = vpop.f32.mrb[10].mxu1  ;;  %v240_v1 = vmax.f32 %v196_v51, 0.0 }
  0xed   :  { %v191_v62 = vadd.f32 %v986_v23, %v190_v59  ;;  %v436_v63 = vadd.f32 %v809_v61, %v977_v14  ;;  %v427_v0 = vpop.f32.mrb[11].mxu1  ;;  %v238_v4 = vmax.f32 %v188_v54, 0.0 }
  0xee   :  { %v241_v2 = vmax.f32 %v199_v58, 0.0  ;;  %v428_v3 = vadd.f32 %v977_v14, %v427_v0 }
  0xef   :  { %v239_v5 = vmax.f32 %v191_v62, 0.0  ;;  %v728_v6 = vpack.c.bf16 %v436_v63, %v433_v56 }
  0xf0   :  { %v678_v7 = vpack.c.bf16 %v241_v2, %v240_v1  ;;  %v723_v8 = vpack.c.bf16 %v428_v3, %v425_v60 }
  0xf1   :  { %v673_v9 = vpack.c.bf16 %v239_v5, %v238_v4  ;;  %v790_v10 = vpop.f32.mrb[8].mxu0  ;;  %751 = vst [vmem:[#allocation4 + $0x28] sm:$0xff] %v728_v6  }
  0xf2   :  { %742 = vst [vmem:[#allocation2 + $0x18] sm:$0xff] %v678_v7   ;;  %v212_v11 = vadd.f32 %v790_v10, %v986_v23  ;;  %v203_v12 = vpop.f32.mrb[9].mxu0  ;;  %750 = vst [vmem:[#allocation4 + $0x20] sm:$0xff] %v723_v8   ;;  %v812_v13 = vpop.f32.mrb[12].mxu1 }
  0xf3   :  { %741 = vst [vmem:[#allocation2 + $0x10] sm:$0xff] %v673_v9   ;;  %v204_v15 = vadd.f32 %v986_v23, %v203_v12  ;;  %v791_v16 = vpop.f32.mrb[10].mxu0  ;;  %v449_v17 = vadd.f32 %v812_v13, %v977_v14  ;;  %v440_v18 = vpop.f32.mrb[13].mxu1 }
  0xf4   :  { %v215_v19 = vadd.f32 %v791_v16, %v986_v23  ;;  %v206_v20 = vpop.f32.mrb[11].mxu0  ;;  %v441_v21 = vadd.f32 %v977_v14, %v440_v18  ;;  %v813_v22 = vpop.f32.mrb[14].mxu1  ;;  %v244_v27 = vmax.f32 %v212_v11, 0.0 }
  0xf5   :  { %v207_v24 = vadd.f32 %v986_v23, %v206_v20  ;;  %v452_v25 = vadd.f32 %v813_v22, %v977_v14  ;;  %v443_v26 = vpop.f32.mrb[15].mxu1  ;;  %v242_v30 = vmax.f32 %v204_v15, 0.0 }
  0xf6   :  { %v245_v28 = vmax.f32 %v215_v19, 0.0  ;;  %v444_v29 = vadd.f32 %v977_v14, %v443_v26 }
  0xf7   :  { %v243_v31 = vmax.f32 %v207_v24, 0.0  ;;  %v738_v32 = vpack.c.bf16 %v452_v25, %v449_v17 }
  0xf8   :  { %v688_v33 = vpack.c.bf16 %v245_v28, %v244_v27  ;;  %v733_v34 = vpack.c.bf16 %v444_v29, %v441_v21 }
  0xf9   :  { %v683_v35 = vpack.c.bf16 %v243_v31, %v242_v30  ;;  %v794_v36 = vpop.f32.mrb[12].mxu0  ;;  %753 = vst [vmem:[#allocation4 + $0x38] sm:$0xff] %v738_v32  }
  0xfa   :  { %744 = vst [vmem:[#allocation2 + $0x28] sm:$0xff] %v688_v33   ;;  %v228_v37 = vadd.f32 %v794_v36, %v986_v23  ;;  %v219_v38 = vpop.f32.mrb[13].mxu0  ;;  %752 = vst [vmem:[#allocation4 + $0x30] sm:$0xff] %v733_v34  }
  0xfb   :  { %743 = vst [vmem:[#allocation2 + $0x20] sm:$0xff] %v683_v35   ;;  %v220_v39 = vadd.f32 %v986_v23, %v219_v38  ;;  %v795_v40 = vpop.f32.mrb[14].mxu0 }
  0xfc   :  { %842 = shalt.err (!%p839_p4)
}
  0xfd   :  { %s843_s25 = scalar_lea.hbm %s1052_s6, 1024 }
  0xfe   :  { %p844_p5 = scmp.ne.s32.totalorder %s1052_s6, %s843_s25  ;;  %p847_p6 = scmp.lt.u32.totalorder %s843_s25, %s1052_s6 }
 0x100   :  { %p849_p7 = pnand %p847_p6, %p844_p5 }
 0x102   :  { %852 = shalt.err (!%p849_p7)
}
 0x103   :  { %s880_s30 = smov 64   ;;  %s881_s3 = smov 4   ;;  %v231_v14 = vadd.f32 %v795_v40, %v986_v23  ;;  %v222_v41 = vpop.f32.mrb[15].mxu0  ;;  %v248_v43 = vmax.f32 %v228_v37, 0.0  ;;  %v246_v45 = vmax.f32 %v220_v39, 0.0 }
 0x104   :  { %558 = dma.vmem_to_hbm [thread:$0]  %s553_s4, 1024, %s1052_s6, [#allocation5], %s880_s30, %s880_s30, %s881_s3   ;;  %v223_v42 = vadd.f32 %v986_v23, %v222_v41 }
 0x105   :  { %v249_v44 = vmax.f32 %v231_v14, 0.0  ;;  %s882_s8 = smov [#allocation2]  }
 0x106   :  { %s540_s9 = sshll.u32 %s882_s8, 4  ;;  %v247_v46 = vmax.f32 %v223_v42, 0.0  ;;  %s541_s9 = int_to_ptr.vmem [resolvable:$true] %s540_s9 }
 0x107   :  { %v698_v47 = vpack.c.bf16 %v249_v44, %v248_v43  ;;  %s853_s10 = scalar_lea.vmem %s541_s9, 1024  ;;  %p858_p9 = scmp.lt.s32.totalorder %s541_s9, %s541_s9 }
 0x108   :  { %v693_v48 = vpack.c.bf16 %v247_v46, %v246_v45  ;;  %p854_p8 = scmp.ne.s32.totalorder %s541_s9, %s853_s10  ;;  %p859_p10 = scmp.lt.s32.totalorder %s853_s10, %s853_s10 }
 0x109   :  { %746 = vst [vmem:[#allocation2 + $0x38] sm:$0xff] %v698_v47  }
 0x10a   :  { %745 = vst [vmem:[#allocation2 + $0x30] sm:$0xff] %v693_v48   ;;  %p860_p11 = por %p859_p10, %p858_p9 }
 0x10c   :  { %p861_p12 = pnand %p860_p11, %p854_p8 }
 0x10e   :  { %864 = shalt.err (!%p861_p12)
}
 0x10f   :  { %s865_s12 = scalar_lea.hbm %s1051_s5, 1024 }
 0x110   :  { %p866_p13 = scmp.ne.s32.totalorder %s1051_s5, %s865_s12  ;;  %p869_p0 = scmp.lt.u32.totalorder %s865_s12, %s1051_s5 }
 0x112   :  { %p871_p1 = pnand %p869_p0, %p866_p13 }
 0x114   :  { %874 = shalt.err (!%p871_p1)
}
 0x115   :  { %546 = dma.vmem_to_hbm [thread:$0]  %s541_s9, 1024, %s1051_s5, [#allocation3], %s880_s30, %s880_s30, %s881_s3  }
 0x116   :  { %875 = dma.done.wait [#allocation3], 1024  }
 0x117   :  { %876 = vsyncadd [#allocation3], 4294966272 }
 0x118   :  { %877 = dma.done.wait [#allocation5], 1024  }
 0x119   :  { %878 = vsyncadd [#allocation5], 4294966272 }
 0x11a   :  { %565 = vsyncpa [#allocation3], 1 }
 0x11b   :  { %566 = vsyncpa [#allocation5], 1 }

</bundles_post_ra>
